<compile_context>
chip_gen: v6e
topology: v6e:2x2x1
jax: 0.10.0
libtpu: 0.0.40
codegen_flags: <defaults>
</compile_context>

<pallas_src>
import math

import jax
import jax.numpy as jnp
from jax.experimental import pallas as pl
from jax.experimental.pallas import tpu as pltpu

IN_DIM = 512        # resnet embedding size
HIDDEN = 128
NUM_CLASSES = 2
PAD_N = 128         # lane-padded logits width for the 2nd matmul (MXU-friendly slab)
MAX_TB = 1024       # batch tile rows: amortizes per-grid-step overhead, VMEM-safe
SUBLANE = 8         # f32 sublane alignment for the batch tile
SPLIT_MIN = 256     # above this, force >=2 grid steps so both v7x TensorCores work
NEG_BIG = -1e30     # baked into padded bias columns -> exp underflows to exactly 0


def _round_up(x, m):
    return ((x + m - 1) // m) * m


def _classifier_kernel(x_ref, w1_ref, b1_ref, w2_ref, b2_ref, o_ref):
    # x arrives as f32; cast to bf16 in-kernel (cheap VPU cast the otherwise
    # memory-bound kernel absorbs for free) so the wrapper never makes a separate
    # HBM cast pass over the embeddings.
    x = x_ref[...].astype(jnp.bfloat16)

    # ---- Linear(512 -> 128) + bias + ReLU (bf16 MXU inputs, f32 accumulation) ----
    h = jnp.dot(x, w1_ref[...], preferred_element_type=jnp.float32)
    h = jnp.maximum(h + b1_ref[...], 0.0)          # b1 is (1, 128), broadcasts over batch

    # Dropout is identity at inference (PyTorch eval semantics).
    # TODO(synk): training-mode dropout would draw a mask via pltpu.prng_random_bits.

    # ---- Linear(128 -> 2) in a lane-padded [TB, 128] slab.  Padded bias columns
    #      hold -1e30, so exp() underflows to 0 there: no iota/where mask needed. ----
    logits = jnp.dot(h.astype(jnp.bfloat16), w2_ref[...],
                     preferred_element_type=jnp.float32)
    logits = logits + b2_ref[...]                  # b2 is (1, 128)

    # ---- Softmax over dim=1 (classes), exact f32 normalization ----
    m = jnp.max(logits, axis=-1, keepdims=True)
    e = jnp.exp(logits - m)
    probs = e / jnp.sum(e, axis=-1, keepdims=True)

    # Narrow writeback: only the 2 real class columns leave the kernel.
    o_ref[...] = probs[:, :NUM_CLASSES].astype(o_ref.dtype)


def prepare_params(w1, b1, w2, b2):
    """One-time parameter prep (hoisted out of the per-call hot path)."""
    w1_bf = w1.astype(jnp.bfloat16)                                   # (512, 128)
    b1_2d = b1.reshape(1, HIDDEN).astype(jnp.float32)                 # (1, 128)
    w2_pad = jnp.zeros((HIDDEN, PAD_N), jnp.bfloat16).at[:, :NUM_CLASSES].set(
        w2.astype(jnp.bfloat16))                                      # (128, 128)
    b2_pad = jnp.full((1, PAD_N), NEG_BIG, jnp.float32).at[0, :NUM_CLASSES].set(
        b2.astype(jnp.float32))                                       # (1, 128)
    return w1_bf, b1_2d, w2_pad, b2_pad


def _choose_tiling(B):
    """Pick (tb, b_pad): big tiles to amortize per-step overhead, >=2 grid steps for
    larger batches (v7x has 2 TensorCores), and at most a few rows of padding."""
    n_tiles = max(1, -(-B // MAX_TB))
    if n_tiles == 1 and B > SPLIT_MIN:
        n_tiles = 2
    tb = _round_up(-(-B // n_tiles), SUBLANE)
    return tb, tb * n_tiles


@jax.jit
def tuning_classifier(x, w1_bf, b1_2d, w2_pad, b2_pad):
    """x: [B, 512] float32 embedding. Returns [B, 2] softmax probabilities."""
    B = x.shape[0]
    tb, b_pad = _choose_tiling(B)

    if b_pad != B:
        x = jnp.pad(x, ((0, b_pad - B), (0, 0)))   # at most tb-ish alignment rows

    cost = pl.CostEstimate(
        flops=2 * b_pad * (IN_DIM * HIDDEN + HIDDEN * PAD_N),
        transcendentals=b_pad * PAD_N,
        bytes_accessed=(b_pad * IN_DIM * 4            # f32 embedding read
                        + b_pad * NUM_CLASSES * 4     # narrow f32 probs writeback
                        + IN_DIM * HIDDEN * 2         # bf16 w1
                        + HIDDEN * PAD_N * 2),        # bf16 w2 (padded)
    )

    out = pl.pallas_call(
        _classifier_kernel,
        out_shape=jax.ShapeDtypeStruct((b_pad, NUM_CLASSES), jnp.float32),
        grid=(b_pad // tb,),
        in_specs=[
            pl.BlockSpec((tb, IN_DIM), lambda i: (i, 0)),        # batch tile, pipelined
            pl.BlockSpec((IN_DIM, HIDDEN), lambda i: (0, 0)),    # weights: VMEM-resident
            pl.BlockSpec((1, HIDDEN), lambda i: (0, 0)),
            pl.BlockSpec((HIDDEN, PAD_N), lambda i: (0, 0)),
            pl.BlockSpec((1, PAD_N), lambda i: (0, 0)),
        ],
        out_specs=pl.BlockSpec((tb, NUM_CLASSES), lambda i: (i, 0)),
        compiler_params=pltpu.CompilerParams(
            dimension_semantics=("parallel",)),                  # megacore-shardable
        cost_estimate=cost,
    )(x, w1_bf, b1_2d, w2_pad, b2_pad)

    # Padded rows (>= B) are garbage by construction; slice them away here.
    return out[:B]


def _init_linear(key, fan_in, fan_out):
    """Deterministic init mimicking torch.nn.Linear (uniform +/- 1/sqrt(fan_in))."""
    kw, kb = jax.random.split(key)
    bound = 1.0 / math.sqrt(fan_in)
    w = jax.random.uniform(kw, (fan_in, fan_out), jnp.float32, -bound, bound)
    b = jax.random.uniform(kb, (fan_out,), jnp.float32, -bound, bound)
    return w, b


def _reference_bf16(x, w1, b1, w2, b2):
    """Mirrors the kernel's arithmetic: bf16 matmul inputs, f32 accumulation."""
    h = jnp.dot(x.astype(jnp.bfloat16), w1.astype(jnp.bfloat16),
                preferred_element_type=jnp.float32) + b1
    h = jnp.maximum(h, 0.0)
    logits = jnp.dot(h.astype(jnp.bfloat16), w2.astype(jnp.bfloat16),
                     preferred_element_type=jnp.float32) + b2
    return jax.nn.softmax(logits, axis=1)


def _reference_f32(x, w1, b1, w2, b2):
    h = jnp.maximum(x @ w1 + b1, 0.0)
    return jax.nn.softmax(h @ w2 + b2, axis=1)


if __name__ == "__main__":
    key = jax.random.PRNGKey(0)
    k_x, k_l1, k_l2 = jax.random.split(key, 3)

    B = 8
    # 512-d embedding as produced by the (untranslated) InceptionResnetV1 backbone.
    x = jax.random.normal(k_x, (B, IN_DIM), jnp.float32)

    w1, b1 = _init_linear(k_l1, IN_DIM, HIDDEN)       # Linear(512, 128)
    w2, b2 = _init_linear(k_l2, HIDDEN, NUM_CLASSES)  # Linear(128, 2)

    params = prepare_params(w1, b1, w2, b2)           # one-time, outside the hot path

    probs = tuning_classifier(x, *params)
    probs = jax.block_until_ready(probs)

    assert probs.shape == (B, NUM_CLASSES)

    # Match against a reference with identical bf16/f32 arithmetic (tight), and the
    # pure-f32 PyTorch-equivalent reference (loose, accounts for bf16 rounding).
    ref_bf16 = _reference_bf16(x, w1, b1, w2, b2)
    ref_f32 = _reference_f32(x, w1, b1, w2, b2)
    assert jnp.allclose(probs, ref_bf16, atol=1e-2, rtol=1e-2)
    assert jnp.allclose(probs, ref_f32, atol=3e-2, rtol=3e-2)
    assert jnp.allclose(jnp.sum(probs, axis=1), 1.0, atol=1e-4)

    print("KERNEL_OK")
</pallas_src>

<mosaic_0001>
module attributes {stable_mosaic.version = 11 : i64} {
  func.func @_classifier_kernel(%arg0: i32, %arg1: memref<8x512xf32, #tpu.memory_space<vmem>>, %arg2: memref<512x128xbf16, #tpu.memory_space<vmem>>, %arg3: memref<1x128xf32, #tpu.memory_space<vmem>>, %arg4: memref<128x128xbf16, #tpu.memory_space<vmem>>, %arg5: memref<1x128xf32, #tpu.memory_space<vmem>>, %arg6: memref<8x2xf32, #tpu.memory_space<vmem>>) attributes {dimension_semantics = [#tpu.dimension_semantics<parallel>], iteration_bounds = array<i64: 1>, scalar_prefetch = 0 : i64, scratch_operands = 0 : i64, tpu.core_type = #tpu.core_type<tc>, window_params = [{transform_indices = @transform_0, window_bounds = array<i64: 8, 512>}, {pipeline_mode = #tpu.pipeline_mode<synchronous>, transform_indices = @transform_1, window_bounds = array<i64: 512, 128>}, {pipeline_mode = #tpu.pipeline_mode<synchronous>, transform_indices = @transform_2, window_bounds = array<i64: 1, 128>}, {pipeline_mode = #tpu.pipeline_mode<synchronous>, transform_indices = @transform_3, window_bounds = array<i64: 128, 128>}, {pipeline_mode = #tpu.pipeline_mode<synchronous>, transform_indices = @transform_4, window_bounds = array<i64: 1, 128>}, {transform_indices = @transform_5, window_bounds = array<i64: 8, 2>}]} {
    %c0 = arith.constant 0 : index
    %c0_0 = arith.constant 0 : index
    %0 = vector.load %arg1[%c0, %c0_0] : memref<8x512xf32, #tpu.memory_space<vmem>>, vector<8x512xf32>
    %1 = arith.truncf %0 : vector<8x512xf32> to vector<8x512xbf16>
    %c0_1 = arith.constant 0 : index
    %c0_2 = arith.constant 0 : index
    %2 = vector.load %arg2[%c0_1, %c0_2] : memref<512x128xbf16, #tpu.memory_space<vmem>>, vector<512x128xbf16>
    %cst = arith.constant dense<0.000000e+00> : vector<8x128xf32>
    %3 = tpu.matmul %1, %2, %cst {dimension_numbers = #tpu.dot_dimension_numbers<[1], [0], [0], [1], [0, 0, 1, 1], [], []>} : vector<8x512xbf16>, vector<512x128xbf16>, vector<8x128xf32> -> vector<8x128xf32>
    %c0_3 = arith.constant 0 : index
    %c0_4 = arith.constant 0 : index
    %4 = vector.load %arg3[%c0_3, %c0_4] : memref<1x128xf32, #tpu.memory_space<vmem>>, vector<1x128xf32>
    %5 = vector.broadcast %4 : vector<1x128xf32> to vector<8x128xf32>
    %6 = arith.addf %3, %5 : vector<8x128xf32>
    %cst_5 = arith.constant 0.000000e+00 : f32
    %7 = vector.broadcast %cst_5 : f32 to vector<8x128xf32>
    %8 = arith.maximumf %6, %7 : vector<8x128xf32>
    %9 = arith.truncf %8 : vector<8x128xf32> to vector<8x128xbf16>
    %c0_6 = arith.constant 0 : index
    %c0_7 = arith.constant 0 : index
    %10 = vector.load %arg4[%c0_6, %c0_7] : memref<128x128xbf16, #tpu.memory_space<vmem>>, vector<128x128xbf16>
    %cst_8 = arith.constant dense<0.000000e+00> : vector<8x128xf32>
    %11 = tpu.matmul %9, %10, %cst_8 {dimension_numbers = #tpu.dot_dimension_numbers<[1], [0], [0], [1], [0, 0, 1, 1], [], []>} : vector<8x128xbf16>, vector<128x128xbf16>, vector<8x128xf32> -> vector<8x128xf32>
    %c0_9 = arith.constant 0 : index
    %c0_10 = arith.constant 0 : index
    %12 = vector.load %arg5[%c0_9, %c0_10] : memref<1x128xf32, #tpu.memory_space<vmem>>, vector<1x128xf32>
    %13 = vector.broadcast %12 : vector<1x128xf32> to vector<8x128xf32>
    %14 = arith.addf %11, %13 : vector<8x128xf32>
    %cst_11 = arith.constant dense<0xFF800000> : vector<8xf32>
    %15 = vector.multi_reduction <maximumf>, %14, %cst_11 [1] : vector<8x128xf32> to vector<8xf32>
    %16 = vector.shape_cast %15 : vector<8xf32> to vector<8x1xf32>
    %17 = vector.broadcast %16 : vector<8x1xf32> to vector<8x128xf32>
    %18 = arith.subf %14, %17 : vector<8x128xf32>
    %19 = math.exp %18 : vector<8x128xf32>
    %cst_12 = arith.constant dense<0.000000e+00> : vector<8xf32>
    %20 = vector.multi_reduction <add>, %19, %cst_12 [1] : vector<8x128xf32> to vector<8xf32>
    %21 = vector.shape_cast %20 : vector<8xf32> to vector<8x1xf32>
    %22 = vector.broadcast %21 : vector<8x1xf32> to vector<8x128xf32>
    %23 = arith.divf %19, %22 : vector<8x128xf32>
    %24 = vector.extract_strided_slice %23 {offsets = [0, 0], sizes = [8, 2], strides = [1, 1]} : vector<8x128xf32> to vector<8x2xf32>
    %c0_13 = arith.constant 0 : index
    %c0_14 = arith.constant 0 : index
    %25 = vector.load %arg6[%c0_13, %c0_14] : memref<8x2xf32, #tpu.memory_space<vmem>>, vector<8x2xf32>
    tpu.vector_store %arg6[%c0_13, %c0_14], %24 {strides = array<i32>} : memref<8x2xf32, #tpu.memory_space<vmem>>, vector<8x2xf32>,
    return
  }
  func.func @transform_0(%arg0: i32) -> (i32, i32) {
    %c0_i32 = arith.constant 0 : i32
    %c0_i32_0 = arith.constant 0 : i32
    return %arg0, %c0_i32 : i32, i32
  }
  func.func @transform_1(%arg0: i32) -> (i32, i32) {
    %c0_i32 = arith.constant 0 : i32
    %c0_i32_0 = arith.constant 0 : i32
    %c0_i32_1 = arith.constant 0 : i32
    return %c0_i32, %c0_i32_0 : i32, i32
  }
  func.func @transform_2(%arg0: i32) -> (i32, i32) {
    %c0_i32 = arith.constant 0 : i32
    %c0_i32_0 = arith.constant 0 : i32
    %c0_i32_1 = arith.constant 0 : i32
    return %c0_i32, %c0_i32_0 : i32, i32
  }
  func.func @transform_3(%arg0: i32) -> (i32, i32) {
    %c0_i32 = arith.constant 0 : i32
    %c0_i32_0 = arith.constant 0 : i32
    %c0_i32_1 = arith.constant 0 : i32
    return %c0_i32, %c0_i32_0 : i32, i32
  }
  func.func @transform_4(%arg0: i32) -> (i32, i32) {
    %c0_i32 = arith.constant 0 : i32
    %c0_i32_0 = arith.constant 0 : i32
    %c0_i32_1 = arith.constant 0 : i32
    return %c0_i32, %c0_i32_0 : i32, i32
  }
  func.func @transform_5(%arg0: i32) -> (i32, i32) {
    %c0_i32 = arith.constant 0 : i32
    %c0_i32_0 = arith.constant 0 : i32
    return %arg0, %c0_i32 : i32, i32
  }
}

</mosaic_0001>

<bundles_post_ra>
// kernel: tuning_classifier.1
= control target key start
LH: loop header
LB: loop body
LE: loop exit
PB: predicated region body
PF: predicated region fallthrough
CT: control target
= control target key end

     0   :  { %10 = vsyncpa [#allocation3], 0  ;;  %s826_s0 = inlined_call_operand.hbm [shape: f32[8,512], index: 0, kind: input, shape index: {}]   ;;  %s827_s1 = inlined_call_operand.hbm [shape: bf16[512,128], index: 1, kind: input, shape index: {}]   ;;  %s828_s2 = inlined_call_operand.vmem [shape: f32[1,128], index: 2, kind: input, shape index: {}]   ;;  %s829_s3 = inlined_call_operand.hbm [shape: bf16[128,128], index: 3, kind: input, shape index: {}]   ;;  %s830_s4 = inlined_call_operand.vmem [shape: f32[1,128], index: 4, kind: input, shape index: {}]   ;;  %s831_s5 = inlined_call_operand.vmem [shape: f32[8,2], index: 5, kind: output, shape index: {}]  }
   0x1   :  { %11 = vsyncpa [#allocation5], 0  ;;  %s771_s18 = smov [#allocation4]  }
   0x2   :  { %s27_s19 = sshll.u32 %s771_s18, 4  ;;  %s28_s19 = int_to_ptr.vmem [resolvable:$true] %s27_s19 }
   0x3   :  { %s715_s20 = scalar_lea.vmem %s28_s19, 4096  ;;  %p720_p1 = scmp.lt.s32.totalorder %s28_s19, %s28_s19 }
   0x4   :  { %p716_p0 = scmp.ne.s32.totalorder %s28_s19, %s715_s20  ;;  %p721_p2 = scmp.lt.s32.totalorder %s715_s20, %s715_s20 }
   0x6   :  { %p722_p3 = por %p721_p2, %p720_p1 }
   0x8   :  { %p723_p4 = pnand %p722_p3, %p716_p0 }
   0xa   :  { %726 = shalt.err (!%p723_p4)
}
   0xb   :  { %s772_s21 = smov 64   ;;  %s773_s22 = smov 4  }
   0xc   :  { %33 = dma.hbm_to_vmem [thread:$0]  %s827_s1, 4096, %s28_s19, [#allocation5], %s772_s21, %s772_s21, %s773_s22  }
   0xd   :  { %s774_s25 = smov [#allocation2]   ;;  %s775_s27 = smov [#allocation6]  }
   0xe   :  { %s18_s26 = sshll.u32 %s774_s25, 4  ;;  %s41_s28 = sshll.u32 %s775_s27, 4  ;;  %s19_s26 = int_to_ptr.vmem [resolvable:$true] %s18_s26  ;;  %s42_s28 = int_to_ptr.vmem [resolvable:$true] %s41_s28 }
   0xf   :  { %s735_s29 = scalar_lea.vmem %s19_s26, 512  ;;  %p740_p6 = scmp.lt.s32.totalorder %s19_s26, %s19_s26 }
  0x10   :  { %p736_p5 = scmp.ne.s32.totalorder %s19_s26, %s735_s29  ;;  %p741_p7 = scmp.lt.s32.totalorder %s735_s29, %s735_s29 }
  0x12   :  { %p742_p8 = por %p741_p7, %p740_p6 }
  0x14   :  { %p743_p9 = pnand %p742_p8, %p736_p5 }
  0x16   :  { %746 = shalt.err (!%p743_p9)
}
  0x17   :  { %21 = dma.hbm_to_vmem [thread:$0]  %s826_s0, 512, %s19_s26, [#allocation3]  }
  0x18   :  { %s755_s7 = scalar_lea.vmem %s42_s28, 1024  ;;  %p760_p11 = scmp.lt.s32.totalorder %s42_s28, %s42_s28 }
  0x19   :  { %p756_p10 = scmp.ne.s32.totalorder %s42_s28, %s755_s7  ;;  %p761_p12 = scmp.lt.s32.totalorder %s755_s7, %s755_s7 }
  0x1b   :  { %p762_p13 = por %p761_p12, %p760_p11 }
  0x1d   :  { %p763_p0 = pnand %p762_p13, %p756_p10 }
  0x1f   :  { %766 = shalt.err (!%p763_p0)
}
  0x20   :  { %47 = dma.hbm_to_vmem [thread:$0]  %s829_s3, 1024, %s42_s28, [#allocation5], %s772_s21, %s772_s21, %s773_s22  }
  0x21   :  { %767 = dma.done.wait [#allocation3], 512  }
  0x22   :  { %768 = vsyncadd [#allocation3], 4294966784 }
  0x23   :  { %769 = dma.done.wait [#allocation5], 5120  }
  0x24   :  { %770 = vsyncadd [#allocation5], 4294962176  ;;  %v663_v0 = vld [vmem:[#allocation4 + $0x78] sm:$0xff]   ;;  %v667_v4 = vld [vmem:[#allocation4 + $0x70] sm:$0xff]   ;;  %v776_v39 = vmov 0.0   ;;  %vm777_vm0 = vmmov 0  }
  0x25   :  { %v664_v1 = vld [vmem:[#allocation4 + $0xf8] sm:$0xff]   ;;  %583 = vmatprep.subr.bf16.mxu0 %v663_v0  ;;  %v668_v5 = vld [vmem:[#allocation4 + $0xf0] sm:$0xff]   ;;  %v671_v8 = vld [vmem:[#allocation4 + $0x68] sm:$0xff]   ;;  %vm533_vm1 = vcmask 15360  }
  0x26   :  { %v665_v2 = vld [vmem:[#allocation4 + $0x38] sm:$0xff]   ;;  %605 = vmatprep.subr.bf16.mxu1 %v664_v1  ;;  %v669_v6 = vld [vmem:[#allocation4 + $0x30] sm:$0xff]   ;;  %v672_v9 = vld [vmem:[#allocation4 + $0xe8] sm:$0xff]  }
  0x27   :  { %v666_v3 = vld [vmem:[#allocation4 + $0xb8] sm:$0xff]   ;;  %584 = vmatpush3.bf16.msra.mxu0 %v665_v2  ;;  %v670_v7 = vld [vmem:[#allocation4 + $0xb0] sm:$0xff]   ;;  %v673_v10 = vld [vmem:[#allocation4 + $0x28] sm:$0xff]  }
  0x28   :  { %606 = vmatpush3.bf16.msra.mxu1 %v666_v3  ;;  %585 = vmatprep.subr.bf16.mxu0 %v667_v4  ;;  %v674_v11 = vld [vmem:[#allocation4 + $0xa8] sm:$0xff]   ;;  %v675_v12 = vld [vmem:[#allocation4 + $0x60] sm:$0xff]   ;;  %v679_v16 = vld [vmem:[#allocation4 + $0x58] sm:$0xff]  }
  0x29   :  { %607 = vmatprep.subr.bf16.mxu1 %v668_v5  ;;  %v676_v13 = vld [vmem:[#allocation4 + $0xe0] sm:$0xff]   ;;  %v680_v17 = vld [vmem:[#allocation4 + $0xd8] sm:$0xff]   ;;  %v683_v20 = vld [vmem:[#allocation4 + $0x50] sm:$0xff]  }
  0x2a   :  { %v677_v14 = vld [vmem:[#allocation4 + $0x20] sm:$0xff]   ;;  %v681_v18 = vld [vmem:[#allocation4 + $0x18] sm:$0xff]   ;;  %v684_v21 = vld [vmem:[#allocation4 + $0xd0] sm:$0xff]  }
  0x2b   :  { %586 = vmatpush3.bf16.msra.mxu0 %v669_v6  ;;  %v678_v15 = vld [vmem:[#allocation4 + $0xa0] sm:$0xff]   ;;  %v682_v19 = vld [vmem:[#allocation4 + $0x98] sm:$0xff]   ;;  %v685_v22 = vld [vmem:[#allocation4 + $0x10] sm:$0xff]  }
  0x2c   :  { %608 = vmatpush3.bf16.msra.mxu1 %v670_v7  ;;  %587 = vmatprep.subr.bf16.mxu0 %v671_v8  ;;  %v686_v23 = vld [vmem:[#allocation4 + $0x90] sm:$0xff]   ;;  %v687_v24 = vld [vmem:[#allocation4 + $0x48] sm:$0xff]   ;;  %v691_v28 = vld [vmem:[#allocation4 + $0x40] sm:$0xff]  }
  0x2d   :  { %609 = vmatprep.subr.bf16.mxu1 %v672_v9  ;;  %v688_v25 = vld [vmem:[#allocation4 + $0xc8] sm:$0xff]   ;;  %v692_v29 = vld [vmem:[#allocation4 + $0xc0] sm:$0xff]   ;;  %v63_v33 = vld [vmem:[#allocation2 + $0x18] sm:$0xff] }
  0x2e   :  { %v689_v26 = vld [vmem:[#allocation4 + $0x8] sm:$0xff]   ;;  %v693_v30 = vld [vmem:[#allocation4] sm:$0xff]   ;;  %v67_v36 = vpack.c.bf16 %v63_v33, %v63_v33  ;;  %v62_v38 = vld [vmem:[#allocation2 + $0x10] sm:$0xff] }
  0x2f   :  { %588 = vmatpush3.bf16.msra.mxu0 %v673_v10  ;;  %v690_v27 = vld [vmem:[#allocation4 + $0x88] sm:$0xff]   ;;  %v694_v31 = vld [vmem:[#allocation4 + $0x80] sm:$0xff]   ;;  %v66_v40 = vpack.c.bf16 %v62_v38, %v62_v38  ;;  %v695_v41 = vld [vmem:[#allocation6 + $0x38] sm:$0xff]  }
  0x30   :  { %610 = vmatpush3.bf16.msra.mxu1 %v674_v11  ;;  %589 = vmatprep.subr.bf16.mxu0 %v675_v12  ;;  %v61_v32 = vld [vmem:[#allocation2 + $0x8] sm:$0xff]  ;;  %v60_v34 = vld [vmem:[#allocation2] sm:$0xff]  ;;  %v696_v42 = vld [vmem:[#allocation6 + $0x30] sm:$0xff]  }
  0x31   :  { %611 = vmatprep.subr.bf16.mxu1 %v676_v13  ;;  %v65_v35 = vpack.c.bf16 %v61_v32, %v61_v32  ;;  %v64_v37 = vpack.c.bf16 %v60_v34, %v60_v34  ;;  %403 = vmatprep.mubr.bf16.mxu1 %v67_v36  ;;  %v697_v43 = vld [vmem:[#allocation6 + $0x28] sm:$0xff]   ;;  %v698_v44 = vld [vmem:[#allocation6 + $0x20] sm:$0xff]   ;;  %v699_v45 = vld [vmem:[#allocation6 + $0x18] sm:$0xff]  }
  0x32   :  { %v700_v46 = vld [vmem:[#allocation6 + $0x10] sm:$0xff]   ;;  %v701_v47 = vld [vmem:[#allocation6 + $0x8] sm:$0xff]   ;;  %v702_v48 = vld [vmem:[#allocation6] sm:$0xff]  }
  0x33   :  { %590 = vmatpush3.bf16.msra.mxu0 %v677_v14  ;;  %363 = vmatprep.mubr.bf16.mxu0 %v65_v35  ;;  %v541_v51 = vld [vmem:[%s828_s2] ss:$0 sm:$0xff] }
  0x34   :  { %612 = vmatpush3.bf16.msra.mxu1 %v678_v15  ;;  %591 = vmatprep.subr.bf16.mxu0 %v679_v16  ;;  %v574_v0 = vld [vmem:[%s830_s4] ss:$0 sm:$0xff] }
  0x35   :  { %613 = vmatprep.subr.bf16.mxu1 %v680_v17 }
  0x37   :  { %592 = vmatpush3.bf16.msra.mxu0 %v681_v18 }
  0x38   :  { %614 = vmatpush3.bf16.msra.mxu1 %v682_v19  ;;  %593 = vmatprep.subr.bf16.mxu0 %v683_v20 }
  0x39   :  { %615 = vmatprep.subr.bf16.mxu1 %v684_v21 }
  0x3b   :  { %594 = vmatpush3.bf16.msra.mxu0 %v685_v22 }
  0x3c   :  { %616 = vmatpush3.bf16.msra.mxu1 %v686_v23  ;;  %595 = vmatprep.subr.bf16.mxu0 %v687_v24 }
  0x3d   :  { %617 = vmatprep.subr.bf16.mxu1 %v688_v25 }
  0x3f   :  { %596 = vmatpush3.bf16.msra.mxu0 %v689_v26 }
  0x40   :  { %618 = vmatpush3.bf16.msra.mxu1 %v690_v27  ;;  %597 = vmatprep.subr.bf16.mxu0 %v691_v28 }
  0x41   :  { %619 = vmatprep.subr.bf16.mxu1 %v692_v29 }
  0x43   :  { %598 = vmatpush3.bf16.msra.mxu0 %v693_v30 }
  0x44   :  { %620 = vmatpush3.bf16.msra.mxu1 %v694_v31  ;;  %636 = vmatprep.subr.bf16.mxu0 %v776_v39 }
  0x46   :  { %364 = vmatmul.mubr.bf16.vlgmr.msra.gmra.mxu0 %v64_v37 }
  0x47   :  { %404 = vmatmul.mubr.bf16.vlgmr.msra.gmra.mxu1 %v66_v40  ;;  %637 = vmatpush3.bf16.msra.mxu0 %v695_v41 }
  0x48   :  { %638 = vmatprep.subr.bf16.mxu0 %v776_v39  ;;  %652 = vmatprep.mubr.msk.bf16.mxu0 %vm777_vm0, %v776_v39 }
  0x4b   :  { %639 = vmatpush3.bf16.msra.mxu0 %v696_v42 }
  0x4c   :  { %640 = vmatprep.subr.bf16.mxu0 %v776_v39 }
  0x4f   :  { %641 = vmatpush3.bf16.msra.mxu0 %v697_v43 }
  0x50   :  { %642 = vmatprep.subr.bf16.mxu0 %v776_v39 }
  0x53   :  { %643 = vmatpush3.bf16.msra.mxu0 %v698_v44 }
  0x54   :  { %644 = vmatprep.subr.bf16.mxu0 %v776_v39 }
  0x57   :  { %645 = vmatpush3.bf16.msra.mxu0 %v699_v45 }
  0x58   :  { %646 = vmatprep.subr.bf16.mxu0 %v776_v39 }
  0x5b   :  { %647 = vmatpush3.bf16.msra.mxu0 %v700_v46 }
  0x5c   :  { %648 = vmatprep.subr.bf16.mxu0 %v776_v39 }
  0x5f   :  { %649 = vmatpush3.bf16.msra.mxu0 %v701_v47 }
  0x60   :  { %650 = vmatprep.subr.bf16.mxu0 %v776_v39 }
  0x63   :  { %651 = vmatpush3.bf16.msra.mxu0 %v702_v48 }
 0x106   :  { %v599_v49 = vpop.f32.mrf.mxu0 }
 0x107   :  { %v621_v50 = vpop.f32.mrf.mxu1 }
 0x108   :  { %v600_v52 = vpop.f32.mrf.mxu0 }
 0x109   :  { %v622_v53 = vpop.f32.mrf.mxu1  ;;  %v601_v54 = vadd.f32 %v600_v52, %v599_v49 }
 0x10a   :  { %v602_v55 = vpop.f32.mrf.mxu0  ;;  %v623_v58 = vadd.f32 %v622_v53, %v621_v50 }
 0x10b   :  { %v624_v56 = vpop.f32.mrf.mxu1  ;;  %v366_v57 = vadd.f32 %v601_v54, %v541_v51 }
 0x10c   :  { %v603_v59 = vpop.f32.mrf.mxu0 }
 0x10d   :  { %v625_v60 = vpop.f32.mrf.mxu1  ;;  %v406_v61 = vadd.f32 %v623_v58, %v366_v57 }
 0x10f   :  { %v411_v62 = vmax.f32 %v406_v61, 0.0 }
 0x111   :  { %v412_v63 = vpack.c.bf16 %v411_v62, %v411_v62 }
 0x113   :  { %653 = vmatmul.mubr.bf16.vlgmr.msra.gmra.mxu0 %v412_v63 }
 0x1d3   :  { %v518_v1 = vpop.f32.mrf.mxu0 }
 0x1d4   :  { %v519_v2 = vadd.f32 %v574_v0, %v518_v1 }
 0x1d5   :  { %v654_v3 = vpop.f32.mrf.mxu0 }
 0x1d6   :  { %524 = vmax.xlane.f32.xlu0 %v519_v2 }
 0x1d7   :  { %v521_v4 = vpop.f32.mrf.mxu0 }
 0x1d9   :  { %v655_v5 = vpop.f32.mrf.mxu0 }
 0x25f   :  { %v525_v6 = vpop.xlane.xlu0 %524 }
 0x260   :  { %v526_v7 = vsub.f32 %v519_v2, %v525_v6 }
 0x262   :  { %v527_v8 = vmul.f32 1.442695, %v526_v7 }
 0x264   :  { %703 = vpow2.f32 %v527_v8 }
 0x271   :  { %v704_v9 = vpop.eup %703 }
 0x272   :  { %529 = vadd.xlane.f32.xlu0 %v704_v9 }
 0x2fb   :  { %v530_v10 = vpop.xlane.xlu0 %529 }
 0x2fc   :  { %705 = vrcp.f32 %v530_v10 }
 0x309   :  { %v706_v11 = vpop.eup %705 }
 0x30a   :  { %v532_v12 = vmul.f32 %v706_v11, %v704_v9 }
 0x30c   :  { %534 = vst.msk [vmem:[%s831_s5] sm:$0xff] %vm533_vm1, %v532_v12 }
 0x30d   :  { %539 = vsyncpa [#allocation3], 1 }
 0x30e   :  { %540 = vsyncpa [#allocation5], 1 }

</bundles_post_ra>
